<compile_context>
chip_gen: v5e
topology: v5e:2x2
jax: 0.10.0
libtpu: 0.0.40
codegen_flags: <defaults>
</compile_context>

<pallas_src>
import functools

import jax
import jax.numpy as jnp
import numpy as np
from jax.experimental import pallas as pl
from jax.experimental.pallas import tpu as pltpu

EPS = 1e-5  # PyTorch BatchNorm default eps


def _round_up(v, m):
    return (v + m - 1) // m * m


# ---------------------------------------------------------------------------
# Fused kernel: bn0 (batch stats) + fc1 + bn1 (batch stats) + sigmoid.
# Grid = (H_pad // tn, D_pad // tk); axis 1 is the contraction.  The (N, tn)
# output block is resident across the contraction and is the accumulator.
# ---------------------------------------------------------------------------
def mlp_fused_kernel(x_ref, g0_ref, b0_ref, w1_ref, b1_ref, g1_ref, bb1_ref,
                     f_ref):
    k = pl.program_id(1)

    @pl.when(k == 0)
    def _():
        # Seed the resident output block with the fc1 bias (added exactly once).
        f_ref[...] = jnp.broadcast_to(b1_ref[...].astype(jnp.float32),
                                      f_ref.shape)

    # ---- BatchNorm1d(D_in), training mode, on this K tile ------------------
    # Exact batch statistics: the block holds the FULL batch (N untiled).
    x = x_ref[...].astype(jnp.float32)                         # (N, tk)
    mean0 = jnp.mean(x, axis=0, keepdims=True)                 # (1, tk)
    var0 = jnp.mean((x - mean0) ** 2, axis=0, keepdims=True)   # biased (torch)
    xn = (x - mean0) * jax.lax.rsqrt(var0 + EPS)
    xn = xn * g0_ref[...] + b0_ref[...]

    # ---- fc1 partial matmul; accumulate directly into the output block -----
    f_ref[...] += jnp.dot(xn.astype(w1_ref.dtype), w1_ref[...],
                          preferred_element_type=jnp.float32)

    # ---- finalize: BatchNorm1d(H) + sigmoid on the finished block -----------
    @pl.when(k == pl.num_programs(1) - 1)
    def _():
        y = f_ref[...]                                         # (N, tn) f32
        mean1 = jnp.mean(y, axis=0, keepdims=True)
        var1 = jnp.mean((y - mean1) ** 2, axis=0, keepdims=True)
        yn = (y - mean1) * jax.lax.rsqrt(var1 + EPS)
        yn = yn * g1_ref[...] + bb1_ref[...]
        f_ref[...] = jax.nn.sigmoid(yn)


@functools.partial(jax.jit, static_argnames=("tk", "tn", "use_bf16_w1"))
def mlp_forward(x, params, *, tk=512, tn=None, use_bf16_w1=False):
    """Pallas implementation of MLP.forward.  Returns `features` (N, H).

    tk: contraction tile (W1 row tile).  For the real module shapes
        (D_in=100000, H=1000) use tk ~ 1024-2048 so each W1 DMA block is
        multi-MB and the kernel sits at the HBM roofline.
    tn: output-feature tile.  Default None = full (padded) H in one block,
        i.e. a pure 1-D reduction grid.  Set e.g. H_pad//2 to split W1 columns
        across the 2 TensorCores on v7x.
    use_bf16_w1: stream W1 as bfloat16 (halves the dominant HBM traffic) while
        still accumulating in f32.
    """
    g0, b0 = params["g0"], params["b0"]
    w1_t, b1 = params["w1_t"], params["b1"]
    g1, bb1 = params["g1"], params["bb1"]
    w2, b2 = params["w2"], params["b2"]

    N, D_in = x.shape
    H = w1_t.shape[1]

    # ---- pad ragged dims to tile multiples (real shapes: 100000, 1000) -----
    D_pad = _round_up(D_in, tk)
    H_pad = _round_up(H, 128)              # lane-dense output
    if tn is None:
        tn = H_pad                         # single (N, H_pad) output block
    assert tn % 128 == 0, "tn must be a multiple of 128"
    H_pad = _round_up(H_pad, tn)

    pd = D_pad - D_in
    ph = H_pad - H
    # Padded input columns are all-zero -> BN0 output there is beta0_pad = 0,
    # and the padded W1 rows are zero, so they contribute nothing to fc1.
    x_p = jnp.pad(x, ((0, 0), (0, pd)))
    g0_p = jnp.pad(g0, ((0, 0), (0, pd)), constant_values=1.0)
    b0_p = jnp.pad(b0, ((0, 0), (0, pd)))
    w1_p = jnp.pad(w1_t, ((0, pd), (0, ph)))
    b1_p = jnp.pad(b1, ((0, 0), (0, ph)))
    g1_p = jnp.pad(g1, ((0, 0), (0, ph)), constant_values=1.0)
    bb1_p = jnp.pad(bb1, ((0, 0), (0, ph)))
    if use_bf16_w1:
        w1_p = w1_p.astype(jnp.bfloat16)

    # ---- VMEM budget: 2x W1 tile (double buffer) + 2x x tile + output ------
    w1_item = 2 if use_bf16_w1 else 4
    est = (2 * N * tk * 4            # x, double-buffered
           + 2 * tk * tn * w1_item   # W1, double-buffered (the hot stream)
           + N * tn * 4              # resident output/accumulator
           + 2 * (2 * tk + 3 * tn) * 4)  # per-feature params
    # Cap well under v7x's 64 MiB physical VMEM so double-buffering survives
    # on every generation; v5e/v6e (128 MiB) have ample headroom.
    vmem_limit = int(min(max(2 * est, 32 * 1024 * 1024), 48 * 1024 * 1024))

    grid = (pl.cdiv(H_pad, tn), pl.cdiv(D_pad, tk))

    features_pad = pl.pallas_call(
        mlp_fused_kernel,
        out_shape=jax.ShapeDtypeStruct((N, H_pad), jnp.float32),
        grid_spec=pltpu.PrefetchScalarGridSpec(
            num_scalar_prefetch=0,
            grid=grid,
            in_specs=[
                pl.BlockSpec((N, tk), lambda j, k: (0, k)),    # x  (full batch)
                pl.BlockSpec((1, tk), lambda j, k: (0, k)),    # gamma0
                pl.BlockSpec((1, tk), lambda j, k: (0, k)),    # beta0
                pl.BlockSpec((tk, tn), lambda j, k: (k, j)),   # W1^T (hot stream)
                pl.BlockSpec((1, tn), lambda j, k: (0, j)),    # fc1 bias (const across k)
                pl.BlockSpec((1, tn), lambda j, k: (0, j)),    # gamma1
                pl.BlockSpec((1, tn), lambda j, k: (0, j)),    # beta1
            ],
            out_specs=pl.BlockSpec((N, tn), lambda j, k: (0, j)),
        ),
        compiler_params=pltpu.CompilerParams(
            dimension_semantics=("parallel", "arbitrary"),
            vmem_limit_bytes=vmem_limit),
    )(x_p, g0_p, b0_p, w1_p, b1_p, g1_p, bb1_p)

    features = features_pad[:, :H]

    # fc2: computed by the reference forward but its result is DISCARDED
    # (forward returns `features`).  Tiny (H x C) dead code; plain JAX, DCE'd.
    _ = features @ w2.T + b2

    return features


def reference_forward(x, params):
    """Pure-JAX reference mirroring the PyTorch training-mode forward."""
    g0, b0, w1_t, b1 = params["g0"], params["b0"], params["w1_t"], params["b1"]
    g1, bb1 = params["g1"], params["bb1"]

    mean0 = jnp.mean(x, axis=0, keepdims=True)
    var0 = jnp.mean((x - mean0) ** 2, axis=0, keepdims=True)
    xn = (x - mean0) * jax.lax.rsqrt(var0 + EPS) * g0 + b0

    y = jnp.dot(xn, w1_t, precision=jax.lax.Precision.HIGHEST) + b1

    mean1 = jnp.mean(y, axis=0, keepdims=True)
    var1 = jnp.mean((y - mean1) ** 2, axis=0, keepdims=True)
    yn = (y - mean1) * jax.lax.rsqrt(var1 + EPS) * g1 + bb1
    return jax.nn.sigmoid(yn)


if __name__ == "__main__":
    # Small shapes consistent with the module structure (reference hardcodes
    # D_in=100000, H=1000, C=8).  Deliberately NOT tile multiples so the
    # padding path used by the real shapes is exercised.
    N, D_IN, H, C = 8, 1000, 200, 8

    key = jax.random.PRNGKey(0)
    ks = jax.random.split(key, 9)

    params = {
        # bn0 affine (PyTorch inits gamma=1, beta=0; perturb deterministically)
        "g0": 1.0 + 0.1 * jax.random.normal(ks[0], (1, D_IN), jnp.float32),
        "b0": 0.1 * jax.random.normal(ks[1], (1, D_IN), jnp.float32),
        # fc1: torch Linear weight is (H, D_in); store transposed for the MXU
        "w1_t": 0.02 * jax.random.normal(ks[2], (D_IN, H), jnp.float32),
        "b1": 0.02 * jax.random.normal(ks[3], (1, H), jnp.float32),
        # bn1 affine
        "g1": 1.0 + 0.1 * jax.random.normal(ks[4], (1, H), jnp.float32),
        "bb1": 0.1 * jax.random.normal(ks[5], (1, H), jnp.float32),
        # fc2 (dead code in the reference forward, kept for fidelity)
        "w2": 0.05 * jax.random.normal(ks[6], (C, H), jnp.float32),
        "b2": 0.05 * jax.random.normal(ks[7], (C,), jnp.float32),
    }

    x = jax.random.normal(ks[8], (N, D_IN), jnp.float32)

    features = mlp_forward(x, params, tk=512)
    features = jax.block_until_ready(features)

    ref = reference_forward(x, params)
    np.testing.assert_allclose(np.asarray(features), np.asarray(ref),
                               atol=5e-3, rtol=5e-3)

    print("KERNEL_OK")
</pallas_src>

<mosaic_0001>
module attributes {stable_mosaic.version = 11 : i64} {
  func.func @mlp_fused_kernel(%arg0: i32, %arg1: i32, %arg2: memref<8x512xf32, #tpu.memory_space<vmem>>, %arg3: memref<1x512xf32, #tpu.memory_space<vmem>>, %arg4: memref<1x512xf32, #tpu.memory_space<vmem>>, %arg5: memref<512x256xf32, #tpu.memory_space<vmem>>, %arg6: memref<1x256xf32, #tpu.memory_space<vmem>>, %arg7: memref<1x256xf32, #tpu.memory_space<vmem>>, %arg8: memref<1x256xf32, #tpu.memory_space<vmem>>, %arg9: memref<8x256xf32, #tpu.memory_space<vmem>>) attributes {dimension_semantics = [#tpu.dimension_semantics<parallel>, #tpu.dimension_semantics<arbitrary>], iteration_bounds = array<i64: 1, 2>, scalar_prefetch = 0 : i64, scratch_operands = 0 : i64, tpu.core_type = #tpu.core_type<tc>, window_params = [{transform_indices = @transform_0, window_bounds = array<i64: 8, 512>}, {transform_indices = @transform_1, window_bounds = array<i64: 1, 512>}, {transform_indices = @transform_2, window_bounds = array<i64: 1, 512>}, {transform_indices = @transform_3, window_bounds = array<i64: 512, 256>}, {transform_indices = @transform_4, window_bounds = array<i64: 1, 256>}, {transform_indices = @transform_5, window_bounds = array<i64: 1, 256>}, {transform_indices = @transform_6, window_bounds = array<i64: 1, 256>}, {transform_indices = @transform_7, window_bounds = array<i64: 8, 256>}]} {
    %c0_i32 = arith.constant 0 : i32
    %0 = arith.cmpi eq, %arg1, %c0_i32 : i32
    %1 = arith.extui %0 : i1 to i32
    %c0_i32_0 = arith.constant 0 : i32
    %2 = arith.cmpi ne, %1, %c0_i32_0 : i32
    scf.if %2 {
      %c0_18 = arith.constant 0 : index
      %c0_19 = arith.constant 0 : index
      %36 = vector.load %arg6[%c0_18, %c0_19] : memref<1x256xf32, #tpu.memory_space<vmem>>, vector<1x256xf32>
      %37 = vector.shape_cast %36 : vector<1x256xf32> to vector<1x256xf32>
      %38 = vector.broadcast %37 : vector<1x256xf32> to vector<8x256xf32>
      %c0_20 = arith.constant 0 : index
      %c0_21 = arith.constant 0 : index
      %39 = vector.load %arg9[%c0_20, %c0_21] : memref<8x256xf32, #tpu.memory_space<vmem>>, vector<8x256xf32>
      tpu.vector_store %arg9[%c0_20, %c0_21], %38 {strides = array<i32>} : memref<8x256xf32, #tpu.memory_space<vmem>>, vector<8x256xf32>,
    } else {
    }
    %c0 = arith.constant 0 : index
    %c0_1 = arith.constant 0 : index
    %3 = vector.load %arg2[%c0, %c0_1] : memref<8x512xf32, #tpu.memory_space<vmem>>, vector<8x512xf32>
    %cst = arith.constant dense<0.000000e+00> : vector<512xf32>
    %4 = vector.multi_reduction <add>, %3, %cst [0] : vector<8x512xf32> to vector<512xf32>
    %5 = vector.shape_cast %4 : vector<512xf32> to vector<1x512xf32>
    %cst_2 = arith.constant 8.000000e+00 : f32
    %6 = vector.broadcast %cst_2 : f32 to vector<1x512xf32>
    %7 = arith.divf %5, %6 : vector<1x512xf32>
    %8 = vector.broadcast %7 : vector<1x512xf32> to vector<8x512xf32>
    %9 = arith.subf %3, %8 : vector<8x512xf32>
    %10 = arith.mulf %9, %9 : vector<8x512xf32>
    %cst_3 = arith.constant dense<0.000000e+00> : vector<512xf32>
    %11 = vector.multi_reduction <add>, %10, %cst_3 [0] : vector<8x512xf32> to vector<512xf32>
    %12 = vector.shape_cast %11 : vector<512xf32> to vector<1x512xf32>
    %cst_4 = arith.constant 8.000000e+00 : f32
    %13 = vector.broadcast %cst_4 : f32 to vector<1x512xf32>
    %14 = arith.divf %12, %13 : vector<1x512xf32>
    %15 = vector.broadcast %7 : vector<1x512xf32> to vector<8x512xf32>
    %16 = arith.subf %3, %15 : vector<8x512xf32>
    %cst_5 = arith.constant 9.99999974E-6 : f32
    %17 = vector.broadcast %cst_5 : f32 to vector<1x512xf32>
    %18 = arith.addf %14, %17 : vector<1x512xf32>
    %19 = math.rsqrt %18 : vector<1x512xf32>
    %20 = vector.broadcast %19 : vector<1x512xf32> to vector<8x512xf32>
    %21 = arith.mulf %16, %20 : vector<8x512xf32>
    %c0_6 = arith.constant 0 : index
    %c0_7 = arith.constant 0 : index
    %22 = vector.load %arg3[%c0_6, %c0_7] : memref<1x512xf32, #tpu.memory_space<vmem>>, vector<1x512xf32>
    %23 = vector.broadcast %22 : vector<1x512xf32> to vector<8x512xf32>
    %24 = arith.mulf %21, %23 : vector<8x512xf32>
    %c0_8 = arith.constant 0 : index
    %c0_9 = arith.constant 0 : index
    %25 = vector.load %arg4[%c0_8, %c0_9] : memref<1x512xf32, #tpu.memory_space<vmem>>, vector<1x512xf32>
    %26 = vector.broadcast %25 : vector<1x512xf32> to vector<8x512xf32>
    %27 = arith.addf %24, %26 : vector<8x512xf32>
    %c0_10 = arith.constant 0 : index
    %c0_11 = arith.constant 0 : index
    %28 = vector.load %arg9[%c0_10, %c0_11] : memref<8x256xf32, #tpu.memory_space<vmem>>, vector<8x256xf32>
    %c0_12 = arith.constant 0 : index
    %c0_13 = arith.constant 0 : index
    %29 = vector.load %arg5[%c0_12, %c0_13] : memref<512x256xf32, #tpu.memory_space<vmem>>, vector<512x256xf32>
    %cst_14 = arith.constant dense<0.000000e+00> : vector<8x256xf32>
    %30 = tpu.matmul %27, %29, %cst_14 {dimension_numbers = #tpu.dot_dimension_numbers<[1], [0], [0], [1], [0, 0, 1, 1], [], []>} : vector<8x512xf32>, vector<512x256xf32>, vector<8x256xf32> -> vector<8x256xf32>
    %31 = arith.addf %28, %30 : vector<8x256xf32>
    %c0_15 = arith.constant 0 : index
    %c0_16 = arith.constant 0 : index
    %32 = vector.load %arg9[%c0_15, %c0_16] : memref<8x256xf32, #tpu.memory_space<vmem>>, vector<8x256xf32>
    tpu.vector_store %arg9[%c0_15, %c0_16], %31 {strides = array<i32>} : memref<8x256xf32, #tpu.memory_space<vmem>>, vector<8x256xf32>,
    %c1_i32 = arith.constant 1 : i32
    %33 = arith.cmpi eq, %arg1, %c1_i32 : i32
    %34 = arith.extui %33 : i1 to i32
    %c0_i32_17 = arith.constant 0 : i32
    %35 = arith.cmpi ne, %34, %c0_i32_17 : i32
    scf.if %35 {
      %c0_18 = arith.constant 0 : index
      %c0_19 = arith.constant 0 : index
      %36 = vector.load %arg9[%c0_18, %c0_19] : memref<8x256xf32, #tpu.memory_space<vmem>>, vector<8x256xf32>
      %cst_20 = arith.constant dense<0.000000e+00> : vector<256xf32>
      %37 = vector.multi_reduction <add>, %36, %cst_20 [0] : vector<8x256xf32> to vector<256xf32>
      %38 = vector.shape_cast %37 : vector<256xf32> to vector<1x256xf32>
      %cst_21 = arith.constant 8.000000e+00 : f32
      %39 = vector.broadcast %cst_21 : f32 to vector<1x256xf32>
      %40 = arith.divf %38, %39 : vector<1x256xf32>
      %41 = vector.broadcast %40 : vector<1x256xf32> to vector<8x256xf32>
      %42 = arith.subf %36, %41 : vector<8x256xf32>
      %43 = arith.mulf %42, %42 : vector<8x256xf32>
      %cst_22 = arith.constant dense<0.000000e+00> : vector<256xf32>
      %44 = vector.multi_reduction <add>, %43, %cst_22 [0] : vector<8x256xf32> to vector<256xf32>
      %45 = vector.shape_cast %44 : vector<256xf32> to vector<1x256xf32>
      %cst_23 = arith.constant 8.000000e+00 : f32
      %46 = vector.broadcast %cst_23 : f32 to vector<1x256xf32>
      %47 = arith.divf %45, %46 : vector<1x256xf32>
      %48 = vector.broadcast %40 : vector<1x256xf32> to vector<8x256xf32>
      %49 = arith.subf %36, %48 : vector<8x256xf32>
      %cst_24 = arith.constant 9.99999974E-6 : f32
      %50 = vector.broadcast %cst_24 : f32 to vector<1x256xf32>
      %51 = arith.addf %47, %50 : vector<1x256xf32>
      %52 = math.rsqrt %51 : vector<1x256xf32>
      %53 = vector.broadcast %52 : vector<1x256xf32> to vector<8x256xf32>
      %54 = arith.mulf %49, %53 : vector<8x256xf32>
      %c0_25 = arith.constant 0 : index
      %c0_26 = arith.constant 0 : index
      %55 = vector.load %arg7[%c0_25, %c0_26] : memref<1x256xf32, #tpu.memory_space<vmem>>, vector<1x256xf32>
      %56 = vector.broadcast %55 : vector<1x256xf32> to vector<8x256xf32>
      %57 = arith.mulf %54, %56 : vector<8x256xf32>
      %c0_27 = arith.constant 0 : index
      %c0_28 = arith.constant 0 : index
      %58 = vector.load %arg8[%c0_27, %c0_28] : memref<1x256xf32, #tpu.memory_space<vmem>>, vector<1x256xf32>
      %59 = vector.broadcast %58 : vector<1x256xf32> to vector<8x256xf32>
      %60 = arith.addf %57, %59 : vector<8x256xf32>
      %61 = arith.negf %60 : vector<8x256xf32>
      %62 = math.exp %61 : vector<8x256xf32>
      %cst_29 = arith.constant 1.000000e+00 : f32
      %63 = vector.broadcast %cst_29 : f32 to vector<8x256xf32>
      %64 = arith.addf %63, %62 : vector<8x256xf32>
      %65 = arith.divf %63, %64 : vector<8x256xf32>
      %c0_30 = arith.constant 0 : index
      %c0_31 = arith.constant 0 : index
      %66 = vector.load %arg9[%c0_30, %c0_31] : memref<8x256xf32, #tpu.memory_space<vmem>>, vector<8x256xf32>
      tpu.vector_store %arg9[%c0_30, %c0_31], %65 {strides = array<i32>} : memref<8x256xf32, #tpu.memory_space<vmem>>, vector<8x256xf32>,
    } else {
    }
    return
  }
  func.func @transform_0(%arg0: i32, %arg1: i32) -> (i32, i32) {
    %c0_i32 = arith.constant 0 : i32
    %c0_i32_0 = arith.constant 0 : i32
    return %c0_i32, %arg1 : i32, i32
  }
  func.func @transform_1(%arg0: i32, %arg1: i32) -> (i32, i32) {
    %c0_i32 = arith.constant 0 : i32
    %c0_i32_0 = arith.constant 0 : i32
    return %c0_i32, %arg1 : i32, i32
  }
  func.func @transform_2(%arg0: i32, %arg1: i32) -> (i32, i32) {
    %c0_i32 = arith.constant 0 : i32
    %c0_i32_0 = arith.constant 0 : i32
    return %c0_i32, %arg1 : i32, i32
  }
  func.func @transform_3(%arg0: i32, %arg1: i32) -> (i32, i32) {
    %c0_i32 = arith.constant 0 : i32
    return %arg1, %arg0 : i32, i32
  }
  func.func @transform_4(%arg0: i32, %arg1: i32) -> (i32, i32) {
    %c0_i32 = arith.constant 0 : i32
    %c0_i32_0 = arith.constant 0 : i32
    return %c0_i32, %arg0 : i32, i32
  }
  func.func @transform_5(%arg0: i32, %arg1: i32) -> (i32, i32) {
    %c0_i32 = arith.constant 0 : i32
    %c0_i32_0 = arith.constant 0 : i32
    return %c0_i32, %arg0 : i32, i32
  }
  func.func @transform_6(%arg0: i32, %arg1: i32) -> (i32, i32) {
    %c0_i32 = arith.constant 0 : i32
    %c0_i32_0 = arith.constant 0 : i32
    return %c0_i32, %arg0 : i32, i32
  }
  func.func @transform_7(%arg0: i32, %arg1: i32) -> (i32, i32) {
    %c0_i32 = arith.constant 0 : i32
    %c0_i32_0 = arith.constant 0 : i32
    return %c0_i32, %arg0 : i32, i32
  }
}

</mosaic_0001>

<bundles_post_ra>
// kernel: mlp_forward.1
= control target key start
LH: loop header
LB: loop body
LE: loop exit
PB: predicated region body
PF: predicated region fallthrough
CT: control target
= control target key end

     0   :  { %12 = vsyncpa [#allocation3], 0  ;;  %s1305_s24 = smov 0   ;;  %s1307_s25 = smov 0   ;;  %s1592_s0 = inlined_call_operand.vmem [shape: f32[8,1024], index: 0, kind: input, shape index: {}]   ;;  %s1593_s1 = inlined_call_operand.vmem [shape: f32[1,1024], index: 1, kind: input, shape index: {}]   ;;  %s1594_s2 = inlined_call_operand.vmem [shape: f32[1,1024], index: 2, kind: input, shape index: {}]   ;;  %s1595_s3 = inlined_call_operand.vmem [shape: f32[1024,256], index: 3, kind: input, shape index: {}]   ;;  %s1596_s4 = inlined_call_operand.vmem [shape: f32[1,256], index: 4, kind: input, shape index: {}]   ;;  %s1597_s5 = inlined_call_operand.vmem [shape: f32[1,256], index: 5, kind: input, shape index: {}]   ;;  %s1598_s6 = inlined_call_operand.vmem [shape: f32[1,256], index: 6, kind: input, shape index: {}]   ;;  %s1599_s7 = inlined_call_operand.hbm [shape: f32[8,256], index: 7, kind: output, shape index: {}]  }
   0x1   :  { %s1309_s26 = smov 0  }
   0x2 LB: > { %s1130_s27 = sadd.s32 4294967295, %s1261_s26   ;;  %s27_s28 = sadd.s32 1, %s1257_s25  ;;  %s1261_s26 = sphi %s1309_s26, %s18_s26   ;;  %s1257_s25 = sphi %s1307_s25, %s1605_s25   ;;  %s1253_s24 = sphi %s1305_s24, %s1604_s24  }
   0x3   : > { %p28_p0 = scmp.ge.s32.totalorder %s27_s28, 2  ;;  %p1136_p1 = scmp.ge.s32.totalorder %s1261_s26, 1 }
   0x4   : > { %p320_p2 = scmp.lt.s32.totalorder %s1261_s26, 3 }
   0x5   : > { %s1607_s28 = smov (%p28_p0, %s27_s28), 0 }
   0x6   : > { %p321_p3 = pnand %p1136_p1, %p320_p2 }
   0x7   : > { %s1137_s29 = sshll.u32 (!%p321_p3), %s1253_s24, 2  ;;  %s1141_s30 = sshll.u32 (!%p321_p3), %s1253_s24, 6 }
   0x8   : > { %324 = sbr.rel (%p321_p3) target bundleno = 364 (0x16c), region = 48  ;;  %p378_p4 = scmp.lt.s32.totalorder (!%p321_p3), %s1137_s29, 7 }
   0x9   : > { %p395_p5 = scmp.lt.s32.totalorder (!%p321_p3), %s1141_s30, 127  ;;  %p1144_p6 = scmp.ne.s32.totalorder (!%p321_p3), %s1253_s24, 0 }
   0xd   : > { %s1609_s29 = smov (!%p378_p4, %s1137_s29), 7  ;;  %s1611_s30 = smov (!%p395_p5, %s1141_s30), 127 }
   0xe   : > { %s1138_s8 = sshll.u32 %s1609_s29, 3  ;;  %s386_s11 = scalar_lea.vmem %s1593_s1, %s1609_s29 }
   0xf   : > { %s1338_s14 = scalar_lea.vmem %s1592_s0, %s1138_s8  ;;  %s391_s17 = scalar_lea.vmem %s1594_s2, %s1609_s29 }
  0x10   : > { %s1152_s18 = sshll.u32 %s1611_s30, 4  ;;  %424 = sbr.rel (%p1144_p6) target bundleno = 26 (0x1a), region = 52 }
  0x11   : > { %s1347_s21 = scalar_lea.vmem %s1595_s3, %s1152_s18 }
  0x15   : > { %v425_v0 = vld [vmem:[%s1596_s4] sm:$0x3] }
  0x16   : > { %v427_v1 = vperm.slane %v425_v0, 0  ;;  %v428_v2 = vperm.slane %v425_v0, 1 }
  0x18   : > { %431 = vst [vmem:[#allocation2] sm:$0xff] %v427_v1 }
  0x19   : > { %432 = vst [vmem:[#allocation2 + $0x8] sm:$0xff] %v428_v2 }
  0x1a PF: > { %v680_v3 = vld [vmem:[%s1347_s21 + $0x2f0] sm:$0xff]  ;;  %v678_v4 = vld [vmem:[%s1347_s21 + $0x2e0] sm:$0xff]  ;;  %v1263_v49 = vmov 8.0   ;;  %p1145_p7 = scmp.ne.s32.totalorder %s1253_s24, 1 }
  0x1b   : > { %v712_v5 = vld [vmem:[%s1347_s21 + $0x3f0] sm:$0xff]  ;;  %754 = vmatpush.msra.mxu2 %v680_v3  ;;  %v710_v9 = vld [vmem:[%s1347_s21 + $0x3e0] sm:$0xff]  ;;  %1185 = vrcp.f32 %v1263_v49  ;;  %v681_v3 = vld [vmem:[%s1347_s21 + $0x2f8] sm:$0xff] }
  0x1c   : > { %774 = vmatpush.msra.mxu3 %v712_v5  ;;  %v616_v6 = vld [vmem:[%s1347_s21 + $0xf0] sm:$0xff]  ;;  %v614_v10 = vld [vmem:[%s1347_s21 + $0xe0] sm:$0xff]  ;;  %v639_v49 = vld [vmem:[%s1347_s21 + $0x1a8] sm:$0xff] }
  0x1d   : > { %v648_v7 = vld [vmem:[%s1347_s21 + $0x1f0] sm:$0xff]  ;;  %714 = vmatpush.msra.mxu0 %v616_v6  ;;  %v646_v11 = vld [vmem:[%s1347_s21 + $0x1e0] sm:$0xff]  ;;  %755 = vmatpush.msra.mxu2 %v678_v4  ;;  %v713_v4 = vld [vmem:[%s1347_s21 + $0x3f8] sm:$0xff] }
  0x1e   : > { %v676_v8 = vld [vmem:[%s1347_s21 + $0x2d0] sm:$0xff]  ;;  %734 = vmatpush.msra.mxu1 %v648_v7  ;;  %775 = vmatpush.msra.mxu3 %v710_v9  ;;  %v674_v14 = vld [vmem:[%s1347_s21 + $0x2c0] sm:$0xff]  ;;  %v617_v9 = vld [vmem:[%s1347_s21 + $0xf8] sm:$0xff] }
  0x1f   : > { %v708_v12 = vld [vmem:[%s1347_s21 + $0x3d0] sm:$0xff]  ;;  %715 = vmatpush.msra.mxu0 %v614_v10  ;;  %v706_v16 = vld [vmem:[%s1347_s21 + $0x3c0] sm:$0xff]  ;;  %756 = vmatpush.msra.mxu2 %v676_v8  ;;  %v679_v8 = vld [vmem:[%s1347_s21 + $0x2e8] sm:$0xff] }
  0x20   : > { %v612_v13 = vld [vmem:[%s1347_s21 + $0xd0] sm:$0xff]  ;;  %735 = vmatpush.msra.mxu1 %v646_v11  ;;  %776 = vmatpush.msra.mxu3 %v708_v12  ;;  %v610_v17 = vld [vmem:[%s1347_s21 + $0xc0] sm:$0xff]  ;;  %v649_v10 = vld [vmem:[%s1347_s21 + $0x1f8] sm:$0xff] }
  0x21   : > { %v644_v15 = vld [vmem:[%s1347_s21 + $0x1d0] sm:$0xff]  ;;  %v642_v18 = vld [vmem:[%s1347_s21 + $0x1c0] sm:$0xff]  ;;  %716 = vmatpush.msra.mxu0 %v612_v13  ;;  %757 = vmatpush.msra.mxu2 %v674_v14  ;;  %v1409_v60 = vpop.eup %1185  ;;  %v711_v11 = vld [vmem:[%s1347_s21 + $0x3e8] sm:$0xff] }
  0x22   : > { %736 = vmatpush.msra.mxu1 %v644_v15  ;;  %v672_v19 = vld [vmem:[%s1347_s21 + $0x2b0] sm:$0xff]  ;;  %777 = vmatpush.msra.mxu3 %v706_v16  ;;  %v670_v23 = vld [vmem:[%s1347_s21 + $0x2a0] sm:$0xff]  ;;  %v462_v5 = vmul.f32 8.0, %v1409_v60  ;;  %v677_v12 = vld [vmem:[%s1347_s21 + $0x2d8] sm:$0xff]  ;;  %vm466_vm0 = vweird.f32 %v1409_v60 }
  0x23   : > { %v704_v20 = vld [vmem:[%s1347_s21 + $0x3b0] sm:$0xff]  ;;  %717 = vmatpush.msra.mxu0 %v610_v17  ;;  %v702_v24 = vld [vmem:[%s1347_s21 + $0x3a0] sm:$0xff]  ;;  %758 = vmatpush.msra.mxu2 %v672_v19  ;;  %v615_v13 = vld [vmem:[%s1347_s21 + $0xe8] sm:$0xff] }
  0x24   : > { %v608_v21 = vld [vmem:[%s1347_s21 + $0xb0] sm:$0xff]  ;;  %737 = vmatpush.msra.mxu1 %v642_v18  ;;  %778 = vmatpush.msra.mxu3 %v704_v20  ;;  %v606_v25 = vld [vmem:[%s1347_s21 + $0xa0] sm:$0xff]  ;;  %v647_v14 = vld [vmem:[%s1347_s21 + $0x1e8] sm:$0xff]  ;;  %v463_v15 = vsub.f32 1.0, %v462_v5 }
  0x25   : > { %v640_v22 = vld [vmem:[%s1347_s21 + $0x1b0] sm:$0xff]  ;;  %v638_v26 = vld [vmem:[%s1347_s21 + $0x1a0] sm:$0xff]  ;;  %718 = vmatpush.msra.mxu0 %v608_v21  ;;  %759 = vmatpush.msra.mxu2 %v670_v23  ;;  %v675_v16 = vld [vmem:[%s1347_s21 + $0x2c8] sm:$0xff] }
  0x26   : > { %738 = vmatpush.msra.mxu1 %v640_v22  ;;  %v668_v27 = vld [vmem:[%s1347_s21 + $0x290] sm:$0xff]  ;;  %779 = vmatpush.msra.mxu3 %v702_v24  ;;  %v666_v31 = vld [vmem:[%s1347_s21 + $0x280] sm:$0xff]  ;;  %v709_v17 = vld [vmem:[%s1347_s21 + $0x3d8] sm:$0xff] }
  0x27   : > { %v700_v28 = vld [vmem:[%s1347_s21 + $0x390] sm:$0xff]  ;;  %719 = vmatpush.msra.mxu0 %v606_v25  ;;  %v698_v32 = vld [vmem:[%s1347_s21 + $0x380] sm:$0xff]  ;;  %760 = vmatpush.msra.mxu2 %v668_v27  ;;  %v613_v18 = vld [vmem:[%s1347_s21 + $0xd8] sm:$0xff] }
  0x28   : > { %v604_v29 = vld [vmem:[%s1347_s21 + $0x90] sm:$0xff]  ;;  %739 = vmatpush.msra.mxu1 %v638_v26  ;;  %780 = vmatpush.msra.mxu3 %v700_v28  ;;  %v602_v33 = vld [vmem:[%s1347_s21 + $0x80] sm:$0xff]  ;;  %v645_v19 = vld [vmem:[%s1347_s21 + $0x1d8] sm:$0xff]  ;;  %v464_v28 = vmul.f32 %v1409_v60, %v463_v15 }
  0x29   : > { %v636_v30 = vld [vmem:[%s1347_s21 + $0x190] sm:$0xff]  ;;  %v634_v34 = vld [vmem:[%s1347_s21 + $0x180] sm:$0xff]  ;;  %720 = vmatpush.msra.mxu0 %v604_v29  ;;  %761 = vmatpush.msra.mxu2 %v666_v31  ;;  %v707_v20 = vld [vmem:[%s1347_s21 + $0x3c8] sm:$0xff] }
  0x2a   : > { %740 = vmatpush.msra.mxu1 %v636_v30  ;;  %v664_v35 = vld [vmem:[%s1347_s21 + $0x270] sm:$0xff]  ;;  %781 = vmatpush.msra.mxu3 %v698_v32  ;;  %v662_v39 = vld [vmem:[%s1347_s21 + $0x260] sm:$0xff]  ;;  %v1439_v23 = vld [vmem:[%s1338_s14 + $0x18] sm:$0xff] }
  0x2b   : > { %v696_v36 = vld [vmem:[%s1347_s21 + $0x370] sm:$0xff]  ;;  %721 = vmatpush.msra.mxu0 %v602_v33  ;;  %v694_v40 = vld [vmem:[%s1347_s21 + $0x360] sm:$0xff]  ;;  %762 = vmatpush.msra.mxu2 %v664_v35  ;;  %v1445_v25 = vld [vmem:[%s1338_s14 + $0x8] sm:$0xff]  ;;  %v455_v29 = vrot.slane %v1439_v23, 4 }
  0x2c   : > { %v600_v37 = vld [vmem:[%s1347_s21 + $0x70] sm:$0xff]  ;;  %741 = vmatpush.msra.mxu1 %v634_v34  ;;  %782 = vmatpush.msra.mxu3 %v696_v36  ;;  %v598_v41 = vld [vmem:[%s1347_s21 + $0x60] sm:$0xff]  ;;  %v673_v26 = vld [vmem:[%s1347_s21 + $0x2b8] sm:$0xff]  ;;  %v443_v31 = vrot.slane %v1445_v25, 4 }
  0x2d   : > { %v632_v38 = vld [vmem:[%s1347_s21 + $0x170] sm:$0xff]  ;;  %v630_v42 = vld [vmem:[%s1347_s21 + $0x160] sm:$0xff]  ;;  %722 = vmatpush.msra.mxu0 %v600_v37  ;;  %763 = vmatpush.msra.mxu2 %v662_v39  ;;  %v611_v27 = vld [vmem:[%s1347_s21 + $0xc8] sm:$0xff]  ;;  %v456_v37 = vadd.f32 %v455_v29, %v1439_v23 }
  0x2e   : > { %742 = vmatpush.msra.mxu1 %v632_v38  ;;  %v660_v43 = vld [vmem:[%s1347_s21 + $0x250] sm:$0xff]  ;;  %783 = vmatpush.msra.mxu3 %v694_v40  ;;  %v658_v47 = vld [vmem:[%s1347_s21 + $0x240] sm:$0xff]  ;;  %v643_v32 = vld [vmem:[%s1347_s21 + $0x1c8] sm:$0xff]  ;;  %v444_v39 = vadd.f32 %v443_v31, %v1445_v25 }
  0x2f   : > { %v692_v44 = vld [vmem:[%s1347_s21 + $0x350] sm:$0xff]  ;;  %723 = vmatpush.msra.mxu0 %v598_v41  ;;  %v690_v48 = vld [vmem:[%s1347_s21 + $0x340] sm:$0xff]  ;;  %764 = vmatpush.msra.mxu2 %v660_v43  ;;  %v705_v33 = vld [vmem:[%s1347_s21 + $0x3b8] sm:$0xff] }
  0x30   : > { %v596_v45 = vld [vmem:[%s1347_s21 + $0x50] sm:$0xff]  ;;  %743 = vmatpush.msra.mxu1 %v630_v42  ;;  %784 = vmatpush.msra.mxu3 %v692_v44  ;;  %v594_v50 = vld [vmem:[%s1347_s21 + $0x40] sm:$0xff]  ;;  %v671_v35 = vld [vmem:[%s1347_s21 + $0x2a8] sm:$0xff] }
  0x31   : > { %v628_v46 = vld [vmem:[%s1347_s21 + $0x150] sm:$0xff]  ;;  %v626_v51 = vld [vmem:[%s1347_s21 + $0x140] sm:$0xff]  ;;  %724 = vmatpush.msra.mxu0 %v596_v45  ;;  %765 = vmatpush.msra.mxu2 %v658_v47  ;;  %v609_v36 = vld [vmem:[%s1347_s21 + $0xb8] sm:$0xff]  ;;  %v465_v45 = vadd.f32 %v1409_v60, %v464_v28 }
  0x32   : > { %744 = vmatpush.msra.mxu1 %v628_v46  ;;  %v656_v52 = vld [vmem:[%s1347_s21 + $0x230] sm:$0xff]  ;;  %785 = vmatpush.msra.mxu3 %v690_v48  ;;  %v654_v56 = vld [vmem:[%s1347_s21 + $0x220] sm:$0xff]  ;;  %v641_v40 = vld [vmem:[%s1347_s21 + $0x1b8] sm:$0xff]  ;;  %v457_v46 = vrot.slane %v456_v37, 2  ;;  %v445_v48 = vrot.slane %v444_v39, 2 }
  0x33   : > { %v688_v53 = vld [vmem:[%s1347_s21 + $0x330] sm:$0xff]  ;;  %725 = vmatpush.msra.mxu0 %v594_v50  ;;  %v686_v57 = vld [vmem:[%s1347_s21 + $0x320] sm:$0xff]  ;;  %766 = vmatpush.msra.mxu2 %v656_v52  ;;  %v703_v41 = vld [vmem:[%s1347_s21 + $0x3a8] sm:$0xff] }
  0x34   : > { %v592_v54 = vld [vmem:[%s1347_s21 + $0x30] sm:$0xff]  ;;  %745 = vmatpush.msra.mxu1 %v626_v51  ;;  %786 = vmatpush.msra.mxu3 %v688_v53  ;;  %v590_v58 = vld [vmem:[%s1347_s21 + $0x20] sm:$0xff]  ;;  %v669_v43 = vld [vmem:[%s1347_s21 + $0x298] sm:$0xff] }
  0x35   : > { %v624_v55 = vld [vmem:[%s1347_s21 + $0x130] sm:$0xff]  ;;  %v622_v59 = vld [vmem:[%s1347_s21 + $0x120] sm:$0xff]  ;;  %726 = vmatpush.msra.mxu0 %v592_v54  ;;  %767 = vmatpush.msra.mxu2 %v654_v56  ;;  %v607_v44 = vld [vmem:[%s1347_s21 + $0xa8] sm:$0xff]  ;;  %v458_v54 = vadd.f32 %v457_v46, %v456_v37  ;;  %v446_v56 = vadd.f32 %v445_v48, %v444_v39 }
  0x36   : > { %746 = vmatpush.msra.mxu1 %v624_v55  ;;  %v652_v61 = vld [vmem:[%s1347_s21 + $0x210] sm:$0xff]  ;;  %787 = vmatpush.msra.mxu3 %v686_v57  ;;  %v650_v1 = vld [vmem:[%s1347_s21 + $0x200] sm:$0xff]  ;;  %v701_v50 = vld [vmem:[%s1347_s21 + $0x398] sm:$0xff] }
  0x37   : > { %v684_v62 = vld [vmem:[%s1347_s21 + $0x310] sm:$0xff]  ;;  %727 = vmatpush.msra.mxu0 %v590_v58  ;;  %v682_v2 = vld [vmem:[%s1347_s21 + $0x300] sm:$0xff]  ;;  %768 = vmatpush.msra.mxu2 %v652_v61  ;;  %v667_v52 = vld [vmem:[%s1347_s21 + $0x288] sm:$0xff] }
  0x38   : > { %v588_v63 = vld [vmem:[%s1347_s21 + $0x10] sm:$0xff]  ;;  %747 = vmatpush.msra.mxu1 %v622_v59  ;;  %788 = vmatpush.msra.mxu3 %v684_v62  ;;  %v586_v6 = vld [vmem:[%s1347_s21] sm:$0xff]  ;;  %v605_v53 = vld [vmem:[%s1347_s21 + $0x98] sm:$0xff] }
  0x39   : > { %v620_v0 = vld [vmem:[%s1347_s21 + $0x110] sm:$0xff]  ;;  %728 = vmatpush.msra.mxu0 %v588_v63  ;;  %v618_v7 = vld [vmem:[%s1347_s21 + $0x100] sm:$0xff]  ;;  %769 = vmatpush.msra.mxu2 %v650_v1  ;;  %v637_v57 = vld [vmem:[%s1347_s21 + $0x198] sm:$0xff]  ;;  %v1478_v63 = vsel %vm466_vm0, %v1409_v60, %v465_v45 }
  0x3a   : > { %748 = vmatpush.msra.mxu1 %v620_v0  ;;  %789 = vmatpush.msra.mxu3 %v682_v2  ;;  %v1435_v21 = vld [vmem:[%s1338_s14 + $0x10] sm:$0xff]  ;;  %v1442_v24 = vld [vmem:[%s1338_s14] sm:$0xff]  ;;  %v699_v58 = vld [vmem:[%s1347_s21 + $0x388] sm:$0xff]  ;;  %v459_v0 = vrot.slane %v458_v54, 1  ;;  %v447_v2 = vrot.slane %v446_v56, 1 }
  0x3b   : > { %834 = vmatpush.msrb.mxu2 %v681_v3  ;;  %729 = vmatpush.msra.mxu0 %v586_v6  ;;  %v449_v22 = vrot.slane %v1435_v21, 4  ;;  %v437_v30 = vrot.slane %v1442_v24, 4  ;;  %v665_v61 = vld [vmem:[%s1347_s21 + $0x278] sm:$0xff]  ;;  %v603_v62 = vld [vmem:[%s1347_s21 + $0x88] sm:$0xff] }
  0x3c   : > { %854 = vmatpush.msrb.mxu3 %v713_v4  ;;  %749 = vmatpush.msra.mxu1 %v618_v7  ;;  %v635_v3 = vld [vmem:[%s1347_s21 + $0x188] sm:$0xff]  ;;  %v697_v4 = vld [vmem:[%s1347_s21 + $0x378] sm:$0xff]  ;;  %v448_v60 = vadd.f32 %v447_v2, %v446_v56 }
  0x3d   : > { %835 = vmatpush.msrb.mxu2 %v679_v8  ;;  %794 = vmatpush.msrb.mxu0 %v617_v9  ;;  %v450_v34 = vadd.f32 %v449_v22, %v1435_v21  ;;  %v438_v38 = vadd.f32 %v437_v30, %v1442_v24  ;;  %v663_v6 = vld [vmem:[%s1347_s21 + $0x268] sm:$0xff]  ;;  %v601_v7 = vld [vmem:[%s1347_s21 + $0x78] sm:$0xff]  ;;  %v460_v8 = vadd.f32 %v459_v0, %v458_v54 }
  0x3e   : > { %814 = vmatpush.msrb.mxu1 %v649_v10  ;;  %855 = vmatpush.msrb.mxu3 %v711_v11  ;;  %v633_v10 = vld [vmem:[%s1347_s21 + $0x178] sm:$0xff]  ;;  %v695_v11 = vld [vmem:[%s1347_s21 + $0x368] sm:$0xff] }
  0x3f   : > { %836 = vmatpush.msrb.mxu2 %v677_v12  ;;  %795 = vmatpush.msrb.mxu0 %v615_v13  ;;  %v451_v42 = vrot.slane %v450_v34, 2  ;;  %v439_v47 = vrot.slane %v438_v38, 2  ;;  %v661_v13 = vld [vmem:[%s1347_s21 + $0x258] sm:$0xff]  ;;  %v471_v15 = vmul.f32 %v1478_v63, %v460_v8  ;;  %v659_v22 = vld [vmem:[%s1347_s21 + $0x248] sm:$0xff] }
  0x40   : > { %815 = vmatpush.msrb.mxu1 %v647_v14  ;;  %856 = vmatpush.msrb.mxu3 %v709_v17  ;;  %v599_v14 = vld [vmem:[%s1347_s21 + $0x68] sm:$0xff]  ;;  %v469_v17 = vmul.f32 %v1478_v63, %v448_v60  ;;  %v597_v46 = vld [vmem:[%s1347_s21 + $0x58] sm:$0xff] }
  0x41   : > { %837 = vmatpush.msrb.mxu2 %v675_v16  ;;  %796 = vmatpush.msrb.mxu0 %v613_v18  ;;  %v452_v51 = vadd.f32 %v451_v42, %v450_v34  ;;  %v440_v55 = vadd.f32 %v439_v47, %v438_v38  ;;  %v631_v18 = vld [vmem:[%s1347_s21 + $0x168] sm:$0xff]  ;;  %v629_v47 = vld [vmem:[%s1347_s21 + $0x158] sm:$0xff] }
  0x42   : > { %816 = vmatpush.msrb.mxu1 %v645_v19  ;;  %857 = vmatpush.msrb.mxu3 %v707_v20  ;;  %v693_v19 = vld [vmem:[%s1347_s21 + $0x358] sm:$0xff]  ;;  %v1505_v28 = vsub.f32 %v1445_v25, %v469_v17  ;;  %v655_v56 = vld [vmem:[%s1347_s21 + $0x228] sm:$0xff] }
  0x43   : > { %838 = vmatpush.msrb.mxu2 %v673_v26  ;;  %797 = vmatpush.msrb.mxu0 %v611_v27  ;;  %v453_v59 = vrot.slane %v452_v51, 1  ;;  %v441_v1 = vrot.slane %v440_v55, 1  ;;  %v1499_v26 = vsub.f32 %v1439_v23, %v471_v15  ;;  %v657_v48 = vld [vmem:[%s1347_s21 + $0x238] sm:$0xff]  ;;  %v587_v17 = vld [vmem:[%s1347_s21 + $0x8] sm:$0xff] }
  0x44   : > { %817 = vmatpush.msrb.mxu1 %v643_v32  ;;  %858 = vmatpush.msrb.mxu3 %v705_v33  ;;  %v625_v0 = vld [vmem:[%s1347_s21 + $0x138] sm:$0xff] }
  0x45   : > { %839 = vmatpush.msrb.mxu2 %v671_v35  ;;  %798 = vmatpush.msrb.mxu0 %v609_v36  ;;  %v454_v5 = vadd.f32 %v453_v59, %v452_v51  ;;  %v442_v9 = vadd.f32 %v441_v1, %v440_v55  ;;  %v595_v51 = vld [vmem:[%s1347_s21 + $0x48] sm:$0xff]  ;;  %v653_v1 = vld [vmem:[%s1347_s21 + $0x218] sm:$0xff] }
  0x46   : > { %818 = vmatpush.msrb.mxu1 %v641_v40  ;;  %859 = vmatpush.msrb.mxu3 %v703_v41  ;;  %v685_v60 = vld [vmem:[%s1347_s21 + $0x318] sm:$0xff] }
  0x47   : > { %840 = vmatpush.msrb.mxu2 %v669_v43  ;;  %799 = vmatpush.msrb.mxu0 %v607_v44  ;;  %v470_v12 = vmul.f32 %v1478_v63, %v454_v5  ;;  %v468_v16 = vmul.f32 %v1478_v63, %v442_v9  ;;  %v623_v5 = vld [vmem:[%s1347_s21 + $0x128] sm:$0xff]  ;;  %v621_v15 = vld [vmem:[%s1347_s21 + $0x118] sm:$0xff] }
  0x48   : > { %819 = vmatpush.msrb.mxu1 %v639_v49  ;;  %860 = vmatpush.msrb.mxu3 %v701_v50  ;;  %v691_v49 = vld [vmem:[%s1347_s21 + $0x348] sm:$0xff] }
  0x49   : > { %841 = vmatpush.msrb.mxu2 %v667_v52  ;;  %800 = vmatpush.msrb.mxu0 %v605_v53  ;;  %v1495_v20 = vsub.f32 %v1435_v21, %v470_v12  ;;  %v1502_v27 = vsub.f32 %v1442_v24, %v468_v16  ;;  %v479_v21 = vmul.f32 %v1499_v26, %v1499_v26  ;;  %v627_v52 = vld [vmem:[%s1347_s21 + $0x148] sm:$0xff] }
  0x4a   : > { %820 = vmatpush.msrb.mxu1 %v637_v57  ;;  %861 = vmatpush.msrb.mxu3 %v699_v58  ;;  %v477_v24 = vmul.f32 %v1505_v28, %v1505_v28  ;;  %v689_v57 = vld [vmem:[%s1347_s21 + $0x338] sm:$0xff]  ;;  %v651_v9 = vld [vmem:[%s1347_s21 + $0x208] sm:$0xff] }
  0x4b   : > { %842 = vmatpush.msrb.mxu2 %v665_v61  ;;  %801 = vmatpush.msrb.mxu0 %v603_v62  ;;  %v478_v29 = vmul.f32 %v1495_v20, %v1495_v20  ;;  %v476_v23 = vmul.f32 %v1502_v27, %v1502_v27  ;;  %v498_v25 = vrot.slane %v479_v21, 4  ;;  %v593_v62 = vld [vmem:[%s1347_s21 + $0x38] sm:$0xff]  ;;  %v683_v16 = vld [vmem:[%s1347_s21 + $0x308] sm:$0xff] }
  0x4c   : > { %821 = vmatpush.msrb.mxu1 %v635_v3  ;;  %862 = vmatpush.msrb.mxu3 %v697_v4  ;;  %v486_v32 = vrot.slane %v477_v24, 4  ;;  %v687_v3 = vld [vmem:[%s1347_s21 + $0x328] sm:$0xff] }
  0x4d   : > { %843 = vmatpush.msrb.mxu2 %v663_v6  ;;  %802 = vmatpush.msrb.mxu0 %v601_v7  ;;  %v492_v30 = vrot.slane %v478_v29, 4  ;;  %v480_v31 = vrot.slane %v476_v23, 4  ;;  %v499_v34 = vadd.f32 %v498_v25, %v479_v21  ;;  %v591_v4 = vld [vmem:[%s1347_s21 + $0x28] sm:$0xff] }
  0x4e   : > { %822 = vmatpush.msrb.mxu1 %v633_v10  ;;  %863 = vmatpush.msrb.mxu3 %v695_v11  ;;  %v487_v36 = vadd.f32 %v486_v32, %v477_v24 }
  0x4f   : > { %844 = vmatpush.msrb.mxu2 %v661_v13  ;;  %803 = vmatpush.msrb.mxu0 %v599_v14  ;;  %v493_v33 = vadd.f32 %v492_v30, %v478_v29  ;;  %v481_v35 = vadd.f32 %v480_v31, %v476_v23  ;;  %v500_v38 = vrot.slane %v499_v34, 2  ;;  %v589_v14 = vld [vmem:[%s1347_s21 + $0x18] sm:$0xff] }
  0x50   : > { %823 = vmatpush.msrb.mxu1 %v631_v18  ;;  %864 = vmatpush.msrb.mxu3 %v693_v19  ;;  %v488_v40 = vrot.slane %v487_v36, 2  ;;  %v619_v18 = vld [vmem:[%s1347_s21 + $0x108] sm:$0xff] }
  0x51   : > { %845 = vmatpush.msrb.mxu2 %v659_v22  ;;  %v494_v37 = vrot.slane %v493_v33, 2  ;;  %v482_v39 = vrot.slane %v481_v35, 2  ;;  %v501_v42 = vadd.f32 %v500_v38, %v499_v34  ;;  %804 = vmatpush.msrb.mxu0 %v597_v46  ;;  %v556_v38 = vld [vmem:[%s386_s11] sm:$0xf] }
  0x52   : > { %v489_v44 = vadd.f32 %v488_v40, %v487_v36  ;;  %824 = vmatpush.msrb.mxu1 %v629_v47  ;;  %865 = vmatpush.msrb.mxu3 %v691_v49  ;;  %v560_v46 = vperm.slane %v556_v38, 2 }
  0x53   : > { %v495_v41 = vadd.f32 %v494_v37, %v493_v33  ;;  %v483_v43 = vadd.f32 %v482_v39, %v481_v35  ;;  %v502_v50 = vrot.slane %v501_v42, 1  ;;  %846 = vmatpush.msrb.mxu2 %v657_v48  ;;  %805 = vmatpush.msrb.mxu0 %v595_v51 }
  0x54   : > { %v490_v54 = vrot.slane %v489_v44, 1  ;;  %825 = vmatpush.msrb.mxu1 %v627_v52  ;;  %866 = vmatpush.msrb.mxu3 %v689_v57  ;;  %v561_v52 = vperm.slane %v556_v38, 3 }
  0x55   : > { %v496_v45 = vrot.slane %v495_v41, 1  ;;  %v484_v53 = vrot.slane %v483_v43, 1  ;;  %v503_v58 = vadd.f32 %v502_v50, %v501_v42  ;;  %847 = vmatpush.msrb.mxu2 %v655_v56  ;;  %806 = vmatpush.msrb.mxu0 %v593_v62  ;;  %v558_v56 = vperm.slane %v556_v38, 0 }
  0x56   : > { %v491_v61 = vadd.f32 %v490_v54, %v489_v44  ;;  %826 = vmatpush.msrb.mxu1 %v625_v0  ;;  %867 = vmatpush.msrb.mxu3 %v687_v3  ;;  %v559_v62 = vperm.slane %v556_v38, 1 }
  0x57   : > { %v497_v55 = vadd.f32 %v496_v45, %v495_v41  ;;  %v485_v59 = vadd.f32 %v484_v53, %v483_v43  ;;  %v507_v6 = vmul.f32 %v503_v58, %v1478_v63  ;;  %848 = vmatpush.msrb.mxu2 %v653_v1  ;;  %807 = vmatpush.msrb.mxu0 %v591_v4  ;;  %v570_v41 = vld [vmem:[%s391_s17] sm:$0xf] }
  0x58   : > { %v505_v8 = vmul.f32 %v491_v61, %v1478_v63  ;;  %827 = vmatpush.msrb.mxu1 %v623_v5  ;;  %868 = vmatpush.msrb.mxu3 %v685_v60  ;;  %v574_v51 = vperm.slane %v570_v41, 2 }
  0x59   : > { %v506_v2 = vmul.f32 %v497_v55, %v1478_v63  ;;  %v504_v7 = vmul.f32 %v485_v59, %v1478_v63  ;;  %v511_v11 = vadd.f32 1e-05, %v507_v6  ;;  %849 = vmatpush.msrb.mxu2 %v651_v9  ;;  %808 = vmatpush.msrb.mxu0 %v589_v14  ;;  %v575_v59 = vperm.slane %v570_v41, 3  ;;  %v584_v14 = vld [vmem:[#allocation2] sm:$0xff] }
  0x5a   : > { %v509_v13 = vadd.f32 1e-05, %v505_v8  ;;  %828 = vmatpush.msrb.mxu1 %v621_v15  ;;  %869 = vmatpush.msrb.mxu3 %v683_v16  ;;  %v573_v6 = vperm.slane %v570_v41, 1 }
  0x5b   : > { %v510_v10 = vadd.f32 1e-05, %v506_v2  ;;  %v508_v12 = vadd.f32 1e-05, %v504_v7  ;;  %809 = vmatpush.msrb.mxu0 %v587_v17  ;;  %vm548_vm3 = vweird.f32 %v511_v11  ;;  %v572_v2 = vperm.slane %v570_v41, 0 }
  0x5c   : > { %829 = vmatpush.msrb.mxu1 %v619_v18  ;;  %vm528_vm8 = vweird.f32 %v509_v13 }
  0x5d   : > { %1187 = vrsqrt.f32 %v510_v10  ;;  %vm538_vm1 = vweird.f32 %v510_v10  ;;  %vm518_vm5 = vweird.f32 %v508_v12 }
  0x5e   : > { %1189 = vrsqrt.f32 %v511_v11 }
  0x5f   : > { %1191 = vrsqrt.f32 %v508_v12 }
  0x60   : > { %1193 = vrsqrt.f32 %v509_v13 }
  0x63   : > { %v1188_v19 = vpop.eup %1187 }
  0x64   : > { %v1190_v22 = vpop.eup %1189  ;;  %v533_v29 = vmul.f32 %v1188_v19, %v510_v10  ;;  %vm539_vm2 = vweird.f32 %v1188_v19 }
  0x65   : > { %v1192_v21 = vpop.eup %1191  ;;  %v543_v23 = vmul.f32 %v1190_v22, %v511_v11  ;;  %vm549_vm4 = vweird.f32 %v1190_v22  ;;  %vm1545_vm7 = vmor %vm538_vm1, %vm539_vm2 }
  0x66   : > { %v1194_v24 = vpop.eup %1193  ;;  %v534_v30 = vmul.f32 %v1188_v19, %v533_v29  ;;  %v513_v25 = vmul.f32 %v1192_v21, %v508_v12  ;;  %vm519_vm6 = vweird.f32 %v1192_v21  ;;  %vm550_vm10 = vmor %vm548_vm3, %vm549_vm4 }
  0x67   : > { %v544_v31 = vmul.f32 %v1190_v22, %v543_v23  ;;  %v523_v32 = vmul.f32 %v1194_v24, %v509_v13  ;;  %vm529_vm9 = vweird.f32 %v1194_v24  ;;  %vm1555_vm11 = vmor %vm518_vm5, %vm519_vm6  ;;  %v585_v23 = vld [vmem:[#allocation2 + $0x8] sm:$0xff] }
  0x68   : > { %v535_v33 = vmul.f32 0.5, %v534_v30  ;;  %v514_v34 = vmul.f32 %v1192_v21, %v513_v25  ;;  %vm530_vm12 = vmor %vm528_vm8, %vm529_vm9 }
  0x69   : > { %v545_v35 = vmul.f32 0.5, %v544_v31  ;;  %v524_v36 = vmul.f32 %v1194_v24, %v523_v32 }
  0x6a   : > { %v536_v37 = vsub.f32 1.5, %v535_v33  ;;  %v515_v39 = vmul.f32 0.5, %v514_v34 }
  0x6b   : > { %v546_v42 = vsub.f32 1.5, %v545_v35  ;;  %v525_v43 = vmul.f32 0.5, %v524_v36 }
  0x6c   : > { %v537_v44 = vmul.f32 %v1188_v19, %v536_v37  ;;  %v516_v45 = vsub.f32 1.5, %v515_v39 }
  0x6d   : > { %v547_v47 = vmul.f32 %v1190_v22, %v546_v42  ;;  %v526_v49 = vsub.f32 1.5, %v525_v43 }
  0x6e   : > { %v541_v50 = vsel %vm1545_vm7, %v1188_v19, %v537_v44  ;;  %v517_v53 = vmul.f32 %v1192_v21, %v516_v45 }
  0x6f   : > { %v554_v54 = vmul.f32 %v541_v50, %v1495_v20  ;;  %v551_v55 = vsel %vm550_vm10, %v1190_v22, %v547_v47  ;;  %v527_v57 = vmul.f32 %v1194_v24, %v526_v49 }
  0x70   : > { %v555_v58 = vmul.f32 %v551_v55, %v1499_v26  ;;  %v521_v61 = vsel %vm1555_vm11, %v1192_v21, %v517_v53 }
  0x71   : > { %v568_v0 = vmul.f32 %v560_v46, %v554_v54  ;;  %v552_v1 = vmul.f32 %v521_v61, %v1502_v27  ;;  %v531_v3 = vsel %vm530_vm12, %v1194_v24, %v527_v57 }
  0x72   : > { %v569_v4 = vmul.f32 %v561_v52, %v555_v58  ;;  %v553_v5 = vmul.f32 %v531_v3, %v1505_v28 }
  0x73   : > { %v582_v20 = vadd.f32 %v574_v51, %v568_v0  ;;  %v566_v7 = vmul.f32 %v558_v56, %v552_v1 }
  0x74   : > { %v583_v8 = vadd.f32 %v575_v59, %v569_v4  ;;  %v567_v9 = vmul.f32 %v559_v62, %v553_v5 }
  0x75   : > { %770 = vmatmul.f32.vlgmr.msra.gmra.mxu2 %v582_v20  ;;  %v580_v26 = vadd.f32 %v572_v2, %v566_v7 }
  0x76   : > { %790 = vmatmul.f32.vlgmr.msra.gmra.mxu3 %v583_v8  ;;  %v581_v60 = vadd.f32 %v573_v6, %v567_v9 }
  0x77   : > { %730 = vmatmul.f32.vlgmr.msra.gmra.mxu0 %v580_v26 }
  0x78   : > { %750 = vmatmul.f32.vlgmr.msra.gmra.mxu1 %v581_v60 }
  0x7d   : > { %850 = vmatmul.f32.vlgmr.msrb.gmra.mxu2 %v582_v20 }
  0x7e   : > { %870 = vmatmul.f32.vlgmr.msrb.gmra.mxu3 %v583_v8 }
  0x7f   : > { %810 = vmatmul.f32.vlgmr.msrb.gmra.mxu0 %v580_v26 }
  0x80   : > { %830 = vmatmul.f32.vlgmr.msrb.gmra.mxu1 %v581_v60 }
  0xf4   : > { %v731_v27 = vpop.f32.mrf.mxu0 }
  0xf5   : > { %v751_v10 = vpop.f32.mrf.mxu1 }
  0xf6   : > { %v752_v11 = vadd.f32 %v751_v10, %v731_v27 }
  0xf8   : > { %v771_v12 = vpop.f32.mrf.mxu2 }
  0xf9   : > { %v772_v28 = vadd.f32 %v771_v12, %v752_v11  ;;  %v791_v13 = vpop.f32.mrf.mxu3 }
  0xfb   : > { %v792_v15 = vadd.f32 %v791_v13, %v772_v28 }
  0xfc   : > { %v811_v16 = vpop.f32.mrf.mxu0 }
  0xfd   : > { %v874_v17 = vadd.f32 %v792_v15, %v584_v14  ;;  %v831_v18 = vpop.f32.mrf.mxu1 }
  0xfe   : > { %v832_v19 = vadd.f32 %v831_v18, %v811_v16 }
  0xff   : > { %876 = vst [vmem:[#allocation2] sm:$0xff] %v874_v17 }
 0x100   : > { %v851_v22 = vpop.f32.mrf.mxu2 }
 0x101   : > { %v852_v29 = vadd.f32 %v851_v22, %v832_v19  ;;  %v871_v21 = vpop.f32.mrf.mxu3 }
 0x103   : > { %v872_v24 = vadd.f32 %v871_v21, %v852_v29  ;;  %881 = sbr.rel (%p1145_p7) target bundleno = 358 (0x166), region = 56 }
 0x105   : > { %v875_v30 = vadd.f32 %v872_v24, %v585_v23 }
 0x107   : > { %877 = vst [vmem:[#allocation2 + $0x8] sm:$0xff] %v875_v30 }
 0x108   : > { %v882_v25 = vld [vmem:[#allocation2] sm:$0xff] }
 0x109   : > { %v884_v32 = vrot.slane %v882_v25, 4  ;;  %v948_v11 = vld [vmem:[%s1598_s6] sm:$0x3] }
 0x10a   : > { %v950_v16 = vperm.slane %v948_v11, 0  ;;  %v951_v19 = vperm.slane %v948_v11, 1 }
 0x10b   : > { %v885_v34 = vadd.f32 %v884_v32, %v882_v25 }
 0x10d   : > { %v886_v36 = vrot.slane %v885_v34, 2 }
 0x10e   : > { %v883_v31 = vld [vmem:[#allocation2 + $0x8] sm:$0xff] }
 0x10f   : > { %v890_v33 = vrot.slane %v883_v31, 4  ;;  %v887_v38 = vadd.f32 %v886_v36, %v885_v34 }
 0x111   : > { %v891_v35 = vadd.f32 %v890_v33, %v883_v31  ;;  %v888_v40 = vrot.slane %v887_v38, 1 }
 0x113   : > { %v892_v37 = vrot.slane %v891_v35, 2  ;;  %v889_v42 = vadd.f32 %v888_v40, %v887_v38 }
 0x115   : > { %v893_v39 = vadd.f32 %v892_v37, %v891_v35  ;;  %v896_v44 = vmul.f32 %v889_v42, %v1478_v63 }
 0x117   : > { %v894_v41 = vrot.slane %v893_v39, 1  ;;  %v898_v46 = vsub.f32 %v882_v25, %v896_v44 }
 0x119   : > { %v895_v43 = vadd.f32 %v894_v41, %v893_v39  ;;  %v900_v48 = vmul.f32 %v898_v46, %v898_v46 }
 0x11b   : > { %v897_v45 = vmul.f32 %v895_v43, %v1478_v63  ;;  %v902_v50 = vrot.slane %v900_v48, 4 }
 0x11d   : > { %v899_v47 = vsub.f32 %v883_v31, %v897_v45  ;;  %v903_v52 = vadd.f32 %v902_v50, %v900_v48 }
 0x11f   : > { %v901_v49 = vmul.f32 %v899_v47, %v899_v47  ;;  %v904_v54 = vrot.slane %v903_v52, 2 }
 0x121   : > { %v908_v51 = vrot.slane %v901_v49, 4  ;;  %v905_v56 = vadd.f32 %v904_v54, %v903_v52 }
 0x123   : > { %v909_v53 = vadd.f32 %v908_v51, %v901_v49  ;;  %v906_v58 = vrot.slane %v905_v56, 1 }
 0x125   : > { %v910_v55 = vrot.slane %v909_v53, 2  ;;  %v907_v61 = vadd.f32 %v906_v58, %v905_v56 }
 0x127   : > { %v911_v57 = vadd.f32 %v910_v55, %v909_v53  ;;  %v914_v0 = vmul.f32 %v907_v61, %v1478_v63 }
 0x129   : > { %v912_v59 = vrot.slane %v911_v57, 1  ;;  %v916_v2 = vadd.f32 1e-05, %v914_v0 }
 0x12b   : > { %v913_v62 = vadd.f32 %v912_v59, %v911_v57  ;;  %1195 = vrsqrt.f32 %v916_v2  ;;  %vm924_vm13 = vweird.f32 %v916_v2 }
 0x12d   : > { %v915_v1 = vmul.f32 %v913_v62, %v1478_v63  ;;  %v940_v63 = vld [vmem:[%s1597_s5] sm:$0x3] }
 0x12e   : > { %v942_v12 = vperm.slane %v940_v63, 0  ;;  %v943_v14 = vperm.slane %v940_v63, 1 }
 0x12f   : > { %v917_v3 = vadd.f32 1e-05, %v915_v1 }
 0x131   : > { %1197 = vrsqrt.f32 %v917_v3  ;;  %v1196_v4 = vpop.eup %1195  ;;  %vm934_vm15 = vweird.f32 %v917_v3 }
 0x132   : > { %v919_v6 = vmul.f32 %v1196_v4, %v916_v2  ;;  %vm925_vm14 = vweird.f32 %v1196_v4 }
 0x133   : > { %vm926_vm1 = vmor %vm924_vm13, %vm925_vm14 }
 0x134   : > { %v920_v7 = vmul.f32 %v1196_v4, %v919_v6 }
 0x136   : > { %v921_v9 = vmul.f32 0.5, %v920_v7 }
 0x137   : > { %v1198_v5 = vpop.eup %1197 }
 0x138   : > { %v929_v20 = vmul.f32 %v1198_v5, %v917_v3  ;;  %vm935_vm0 = vweird.f32 %v1198_v5  ;;  %v922_v60 = vsub.f32 1.5, %v921_v9 }
 0x139   : > { %vm936_vm2 = vmor %vm934_vm15, %vm935_vm0 }
 0x13a   : > { %v930_v8 = vmul.f32 %v1198_v5, %v929_v20  ;;  %v923_v10 = vmul.f32 %v1196_v4, %v922_v60 }
 0x13c   : > { %v931_v26 = vmul.f32 0.5, %v930_v8  ;;  %v927_v13 = vsel %vm926_vm1, %v1196_v4, %v923_v10 }
 0x13d   : > { %v938_v15 = vmul.f32 %v927_v13, %v898_v46 }
 0x13e   : > { %v932_v27 = vsub.f32 1.5, %v931_v26 }
 0x13f   : > { %v946_v22 = vmul.f32 %v942_v12, %v938_v15 }
 0x140   : > { %v933_v28 = vmul.f32 %v1198_v5, %v932_v27 }
 0x141   : > { %v954_v21 = vadd.f32 %v950_v16, %v946_v22 }
 0x142   : > { %v937_v17 = vsel %vm936_vm2, %v1198_v5, %v933_v28 }
 0x143   : > { %v939_v18 = vmul.f32 %v937_v17, %v899_v47  ;;  %v1146_v24 = vmul.f32 -1.442695, %v954_v21 }
 0x145   : > { %v947_v29 = vmul.f32 %v943_v14, %v939_v18  ;;  %1199 = vpow2.f32 %v1146_v24 }
 0x147   : > { %v955_v23 = vadd.f32 %v951_v19, %v947_v29 }
 0x149   : > { %v1147_v30 = vmul.f32 -1.442695, %v955_v23 }
 0x14b   : > { %1201 = vpow2.f32 %v1147_v30  ;;  %v1200_v25 = vpop.eup %1199 }
 0x14c   : > { %v962_v32 = vadd.f32 1.0, %v1200_v25 }
 0x14e   : > { %1203 = vrcp.f32 %v962_v32  ;;  %vm969_vm3 = vweird.f32 %v962_v32  ;;  %v975_v37 = vand.u32 2147483648, %v962_v32  ;;  %v973_v40 = vand.u32 2147483647, %v962_v32 }
 0x150   : > { %v976_v45 = vor.u32 1.1754944e-38, %v975_v37  ;;  %vm974_vm8 = vcmp.eq.f32.partialorder %v973_v40, 8.507059e+37 }
 0x151   : > { %v1202_v31 = vpop.eup %1201 }
 0x152   : > { %v963_v33 = vadd.f32 1.0, %v1202_v31 }
 0x154   : > { %1205 = vrcp.f32 %v963_v33  ;;  %v1204_v34 = vpop.eup %1203  ;;  %v990_v41 = vand.u32 2147483648, %v963_v33  ;;  %vm984_vm5 = vweird.f32 %v963_v33  ;;  %v988_v43 = vand.u32 2147483647, %v963_v33 }
 0x155   : > { %v965_v36 = vmul.f32 %v1204_v34, %v962_v32  ;;  %vm970_vm4 = vweird.f32 %v1204_v34 }
 0x156   : > { %vm971_vm7 = vmor %vm969_vm3, %vm970_vm4  ;;  %v991_v48 = vor.u32 1.1754944e-38, %v990_v41  ;;  %vm989_vm10 = vcmp.eq.f32.partialorder %v988_v43, 8.507059e+37 }
 0x157   : > { %v966_v39 = vsub.f32 1.0, %v965_v36 }
 0x159   : > { %v967_v44 = vmul.f32 %v1204_v34, %v966_v39 }
 0x15a   : > { %v1206_v35 = vpop.eup %1205 }
 0x15b   : > { %v980_v38 = vmul.f32 %v1206_v35, %v963_v33  ;;  %vm985_vm6 = vweird.f32 %v1206_v35  ;;  %v968_v47 = vadd.f32 %v1204_v34, %v967_v44 }
 0x15c   : > { %vm986_vm9 = vmor %vm984_vm5, %vm985_vm6 }
 0x15d   : > { %v981_v42 = vsub.f32 1.0, %v980_v38  ;;  %v972_v50 = vsel %vm971_vm7, %v1204_v34, %v968_v47 }
 0x15e   : > { %v977_v51 = vsel %vm974_vm8, %v976_v45, %v972_v50 }
 0x15f   : > { %v982_v46 = vmul.f32 %v1206_v35, %v981_v42  ;;  %994 = vst [vmem:[#allocation2] sm:$0xff] %v977_v51 }
 0x161   : > { %v983_v49 = vadd.f32 %v1206_v35, %v982_v46 }
 0x163   : > { %v987_v52 = vsel %vm986_vm9, %v1206_v35, %v983_v49 }
 0x164   : > { %v992_v53 = vsel %vm989_vm10, %v991_v48, %v987_v52 }
 0x165   : > { %995 = vst [vmem:[#allocation2 + $0x8] sm:$0xff] %v992_v53 }
 0x166 PF: > { %p1157_p8 = scmp.eq.s32.totalorder %s1130_s27, 1  ;;  %s1007_s15 = sshll.u32 %s1599_s7, 4  ;;  %s1008_s15 = int_to_ptr.hbm [resolvable:$true] %s1007_s15 }
 0x167   : > { %s1264_s16 = smov [#allocation2]  }
 0x168   : > { %s1005_s17 = sshll.u32 %s1264_s16, 4  ;;  %s1006_s17 = int_to_ptr.vmem [resolvable:$true] %s1005_s17 }
 0x169   : > { %1154 = dma.vmem_to_hbm [thread:$0]  (%p1157_p8), %s1006_s17, 256, %s1008_s15, [#allocation3]  }
 0x16a   : > { %1248 = dma.done.wait (%p1157_p8), [#allocation3], 256  }
 0x16b   : > { %1250 = vsyncadd (%p1157_p8), [#allocation3], 4294967040 }
 0x16c PF: > { %s18_s26 = sadd.s32 1, %s1261_s26   ;;  %s1604_s24 = smov %s1257_s25 }
 0x16d   : > { %p15_p9 = scmp.ge.s32.totalorder %s18_s26, 4   ;;  %s1605_s25 = smov %s1607_s28 }
 0x16f   :  { %17 = sbr.rel (!%p15_p9) target bundleno = 2 (0x2), region = 102 }
 0x174   :  { %1021 = vsyncpa [#allocation3], 1 }
 0x175   :  { %1023 = vsyncpa [#allocation3 + $0x1], 1 }

</bundles_post_ra>
